<compile_context>
chip_gen: v5e
topology: v5e:2x2
jax: 0.10.0
libtpu: 0.0.40
codegen_flags: <defaults>
</compile_context>

<pallas_src>
import math

import jax
import jax.numpy as jnp
from jax.experimental import pallas as pl
from jax.experimental.pallas import tpu as pltpu


def _round_up(x, m):
    return ((x + m - 1) // m) * m


def _sublane_rows(dtype):
    """Sublane tile height for a dtype: 8 for 4-byte, 16 for 2-byte, 32 for 1-byte."""
    itemsize = jnp.dtype(dtype).itemsize
    return {4: 8, 2: 16, 1: 32}.get(itemsize, 8)


def _vmem_config():
    """Returns (tiling budget bytes, vmem_limit_bytes), generation-aware."""
    cap = None
    try:
        cap = getattr(pltpu.get_tpu_info(), "vmem_capacity_bytes", None)
    except Exception:
        cap = None
    if cap is None:
        cap = 64 << 20                       # conservative default
    if cap <= (64 << 20):                    # v7x-class: 64 MiB physical per TC
        return 24 << 20, 32 << 20
    return 40 << 20, 56 << 20                # v5e / v6e: 128 MiB physical


# ~0.35 us per grid step converted to "equivalent HBM bytes" (~1.1 TB/s).
_STEP_OVERHEAD_BYTES = 400_000


def _est_traffic(m, hid, out, tm, tn, tk, itemsize):
    """Approximate (HBM bytes moved, grid steps) for a (tm, tn, tk) tiling."""
    num_m = -(-m // tm)
    num_n = -(-out // tn)
    num_k = -(-hid // tk)
    # x block index changes only with (i, k); with K untiled it is constant
    # across the N axis, so x is streamed once total (Pallas skips repeat DMAs).
    x_bytes = (1 if num_k == 1 else num_n) * m * hid * itemsize
    # Weight blocks are revisited once per M tile unless the whole weight is a
    # single resident block.
    w_bytes = (1 if (num_n == 1 and num_k == 1) else num_m) * hid * out * itemsize
    o_bytes = m * out * itemsize
    steps = num_m * num_n * num_k
    return x_bytes + w_bytes + o_bytes, steps


def _choose_tiles(m, hid, out, itemsize, sublane, budget):
    """Pick (tm, tn, tk) fitting `budget` with minimal estimated HBM traffic."""
    m = max(m, 1)
    # Cap tm so the M grid has >= 2 steps whenever m allows (v7x: both cores).
    tm_cap = max(sublane, _round_up(-(-m // 2), sublane))
    tm_cands = sorted(
        {min(max(sublane, _round_up(t, sublane)), tm_cap)
         for t in (2048, 1024, 512, 256, 128, 64, 32, 16, 8)},
        reverse=True,
    )

    tn_cands = []
    if out <= 2048:
        tn_cands.append(out)                 # full output width (always legal)
    tn_cands += [c for c in (2048, 1024, 512, 256, 128) if c < out]

    # K is only tiled with exact divisors of hid (no garbage accumulation);
    # tk must also be a multiple of 128 (lane dim of the x block).
    tk_cands = [hid] + [c for c in (2048, 1024, 512, 256, 128)
                        if c < hid and hid % c == 0]

    best_key = None
    best_tiles = None
    for tn in tn_cands:
        for tk in tk_cands:
            for tm in tm_cands:
                k_tiled = tk < hid
                # Double-buffered x / w / bias / out tiles (+ f32 acc if K-tiled).
                need = (2 * tm * tk + 2 * tk * tn + 2 * tn + 2 * tm * tn) * itemsize
                if k_tiled:
                    need += tm * tn * 4
                if need > budget:
                    continue
                byts, steps = _est_traffic(m, hid, out, tm, tn, tk, itemsize)
                key = (byts + steps * _STEP_OVERHEAD_BYTES, -tm)
                if best_key is None or key < best_key:
                    best_key = key
                    best_tiles = (tm, tn, tk)
    if best_tiles is not None:
        return best_tiles
    # Nothing fits the budget: fall back to the smallest legal tiles.
    # TODO(synk): add a second-level K split (emit_pipeline) for pathological dims.
    tn = out if out <= 128 else 128
    tk = hid if (hid <= 128 or hid % 128 != 0) else 128
    return sublane, tn, tk


def _linear_kernel(x_ref, w_ref, b_ref, o_ref):
    # x: (tm, K), w: (K, tn), b: (1, tn), o: (tm, tn)  -- no K tiling.
    y = jnp.dot(x_ref[...], w_ref[...], preferred_element_type=jnp.float32)
    o_ref[...] = (y + b_ref[...].astype(jnp.float32)).astype(o_ref.dtype)


def _linear_kernel_ktiled(x_ref, w_ref, b_ref, o_ref, acc_ref):
    # x: (tm, tk), w: (tk, tn), b: (1, tn), o/acc: (tm, tn); grid axis 2 = K.
    @pl.when(pl.program_id(2) == 0)
    def _():
        acc_ref[...] = jnp.zeros_like(acc_ref)

    acc_ref[...] += jnp.dot(x_ref[...], w_ref[...],
                            preferred_element_type=jnp.float32)

    @pl.when(pl.program_id(2) == pl.num_programs(2) - 1)
    def _():
        o_ref[...] = (acc_ref[...] + b_ref[...].astype(jnp.float32)).astype(o_ref.dtype)


def decoder_forward(x, weight, bias):
    """Pallas equivalent of nn.Linear(hid_dim, 2*feat_dim)(x).

    x      : (..., hid_dim)
    weight : (2*feat_dim, hid_dim)   -- PyTorch (out_features, in_features)
    bias   : (2*feat_dim,)
    returns: (..., 2*feat_dim)
    """
    hid_dim = x.shape[-1]
    out_dim = weight.shape[0]
    lead = x.shape[:-1]
    m = 1
    for d in lead:
        m *= d

    x_flat = x.reshape(m, hid_dim)
    # One-time transpose to (hid_dim, out_dim): canonical (M,K)x(K,N) layout for
    # the MXU instead of a transposed RHS on every grid step.
    w_t = weight.T
    b2d = bias.reshape(1, out_dim)

    itemsize = jnp.dtype(x.dtype).itemsize
    sublane = _sublane_rows(x.dtype)
    budget, vmem_limit = _vmem_config()
    tm, tn, tk = _choose_tiles(m, hid_dim, out_dim, itemsize, sublane, budget)

    num_m = pl.cdiv(m, tm)
    num_n = pl.cdiv(out_dim, tn)
    num_k = hid_dim // tk                     # tk always divides hid_dim exactly

    byts, _ = _est_traffic(m, hid_dim, out_dim, tm, tn, tk, itemsize)
    cost = pl.CostEstimate(
        flops=2 * m * hid_dim * out_dim,
        transcendentals=0,
        bytes_accessed=byts,
    )

    if num_k == 1:
        out_flat = pl.pallas_call(
            _linear_kernel,
            out_shape=jax.ShapeDtypeStruct((m, out_dim), x.dtype),
            grid=(num_m, num_n),
            in_specs=[
                pl.BlockSpec((tm, hid_dim), lambda i, j: (i, 0)),   # x row tile
                pl.BlockSpec((hid_dim, tn), lambda i, j: (0, j)),   # weight strip
                pl.BlockSpec((1, tn), lambda i, j: (0, j)),         # bias strip
            ],
            out_specs=pl.BlockSpec((tm, tn), lambda i, j: (i, j)),
            compiler_params=pltpu.CompilerParams(
                dimension_semantics=("parallel", "parallel"),
                vmem_limit_bytes=vmem_limit,
            ),
            cost_estimate=cost,
        )(x_flat, w_t, b2d)
    else:
        out_flat = pl.pallas_call(
            _linear_kernel_ktiled,
            out_shape=jax.ShapeDtypeStruct((m, out_dim), x.dtype),
            grid=(num_m, num_n, num_k),
            in_specs=[
                pl.BlockSpec((tm, tk), lambda i, j, k: (i, k)),
                pl.BlockSpec((tk, tn), lambda i, j, k: (k, j)),
                pl.BlockSpec((1, tn), lambda i, j, k: (0, j)),
            ],
            out_specs=pl.BlockSpec((tm, tn), lambda i, j, k: (i, j)),
            scratch_shapes=[pltpu.VMEM((tm, tn), jnp.float32)],
            compiler_params=pltpu.CompilerParams(
                dimension_semantics=("parallel", "parallel", "arbitrary"),
                vmem_limit_bytes=vmem_limit,
            ),
            cost_estimate=cost,
        )(x_flat, w_t, b2d)

    return out_flat.reshape(*lead, out_dim)


def init_decoder_params(key, feat_dim, hid_dim, dtype=jnp.float32):
    """Deterministic init matching nn.Linear default (kaiming-uniform-ish)."""
    out_dim = 2 * feat_dim
    k_w, k_b = jax.random.split(key)
    bound_w = 1.0 / math.sqrt(hid_dim)
    weight = jax.random.uniform(
        k_w, (out_dim, hid_dim), dtype=dtype, minval=-bound_w, maxval=bound_w
    )
    bias = jax.random.uniform(
        k_b, (out_dim,), dtype=dtype, minval=-bound_w, maxval=bound_w
    )
    return weight, bias


if __name__ == "__main__":
    feat_dim = 16          # output dim = 2 * feat_dim = 32
    hid_dim = 32
    batch, seq = 2, 8      # x: (2, 8, 32) -> M = 16 rows

    key = jax.random.PRNGKey(0)
    k_x, k_p = jax.random.split(key)

    x = jax.random.normal(k_x, (batch, seq, hid_dim), dtype=jnp.float32)
    weight, bias = init_decoder_params(k_p, feat_dim, hid_dim)

    out = jax.block_until_ready(decoder_forward(x, weight, bias))
    ref = x @ weight.T + bias
    assert out.shape == (batch, seq, 2 * feat_dim), out.shape
    assert jnp.allclose(out, ref, atol=1e-5, rtol=1e-5), "mismatch vs reference"

    # Non-multiple-of-tile M to exercise the masked tail block (no wrapper pad).
    x2 = jax.random.normal(jax.random.PRNGKey(1), (3, 37, hid_dim), dtype=jnp.float32)
    out2 = jax.block_until_ready(decoder_forward(x2, weight, bias))
    ref2 = x2 @ weight.T + bias
    assert jnp.allclose(out2, ref2, atol=1e-5, rtol=1e-5), "mismatch vs reference (tail)"

    print("KERNEL_OK")
</pallas_src>

<mosaic_0001>
module attributes {stable_mosaic.version = 11 : i64} {
  func.func @_linear_kernel(%arg0: i32, %arg1: i32, %arg2: memref<8x32xf32, #tpu.memory_space<vmem>>, %arg3: memref<32x32xf32, #tpu.memory_space<vmem>>, %arg4: memref<1x32xf32, #tpu.memory_space<vmem>>, %arg5: memref<8x32xf32, #tpu.memory_space<vmem>>) attributes {dimension_semantics = [#tpu.dimension_semantics<parallel>, #tpu.dimension_semantics<parallel>], iteration_bounds = array<i64: 2, 1>, scalar_prefetch = 0 : i64, scratch_operands = 0 : i64, tpu.core_type = #tpu.core_type<tc>, window_params = [{transform_indices = @transform_0, window_bounds = array<i64: 8, 32>}, {transform_indices = @transform_1, window_bounds = array<i64: 32, 32>}, {transform_indices = @transform_2, window_bounds = array<i64: 1, 32>}, {transform_indices = @transform_3, window_bounds = array<i64: 8, 32>}]} {
    %c0 = arith.constant 0 : index
    %c0_0 = arith.constant 0 : index
    %0 = vector.load %arg2[%c0, %c0_0] : memref<8x32xf32, #tpu.memory_space<vmem>>, vector<8x32xf32>
    %c0_1 = arith.constant 0 : index
    %c0_2 = arith.constant 0 : index
    %1 = vector.load %arg3[%c0_1, %c0_2] : memref<32x32xf32, #tpu.memory_space<vmem>>, vector<32x32xf32>
    %cst = arith.constant dense<0.000000e+00> : vector<8x32xf32>
    %2 = tpu.matmul %0, %1, %cst {dimension_numbers = #tpu.dot_dimension_numbers<[1], [0], [0], [1], [0, 0, 1, 1], [], []>} : vector<8x32xf32>, vector<32x32xf32>, vector<8x32xf32> -> vector<8x32xf32>
    %c0_3 = arith.constant 0 : index
    %c0_4 = arith.constant 0 : index
    %3 = vector.load %arg4[%c0_3, %c0_4] : memref<1x32xf32, #tpu.memory_space<vmem>>, vector<1x32xf32>
    %4 = vector.broadcast %3 : vector<1x32xf32> to vector<8x32xf32>
    %5 = arith.addf %2, %4 : vector<8x32xf32>
    %c0_5 = arith.constant 0 : index
    %c0_6 = arith.constant 0 : index
    %6 = vector.load %arg5[%c0_5, %c0_6] : memref<8x32xf32, #tpu.memory_space<vmem>>, vector<8x32xf32>
    tpu.vector_store %arg5[%c0_5, %c0_6], %5 {strides = array<i32>} : memref<8x32xf32, #tpu.memory_space<vmem>>, vector<8x32xf32>,
    return
  }
  func.func @transform_0(%arg0: i32, %arg1: i32) -> (i32, i32) {
    %c0_i32 = arith.constant 0 : i32
    %c0_i32_0 = arith.constant 0 : i32
    return %arg0, %c0_i32 : i32, i32
  }
  func.func @transform_1(%arg0: i32, %arg1: i32) -> (i32, i32) {
    %c0_i32 = arith.constant 0 : i32
    %c0_i32_0 = arith.constant 0 : i32
    return %c0_i32, %arg1 : i32, i32
  }
  func.func @transform_2(%arg0: i32, %arg1: i32) -> (i32, i32) {
    %c0_i32 = arith.constant 0 : i32
    %c0_i32_0 = arith.constant 0 : i32
    return %c0_i32, %arg1 : i32, i32
  }
  func.func @transform_3(%arg0: i32, %arg1: i32) -> (i32, i32) {
    %c0_i32 = arith.constant 0 : i32
    return %arg0, %arg1 : i32, i32
  }
}

</mosaic_0001>

<bundles_post_ra>
// kernel: tpu_custom_call.1
= control target key start
LH: loop header
LB: loop body
LE: loop exit
PB: predicated region body
PF: predicated region fallthrough
CT: control target
= control target key end

     0   :  { %8 = vsyncpa [#allocation3], 0  ;;  %s804_s0 = inlined_call_operand.hbm [shape: f32[16,32], index: 0, kind: input, shape index: {}]   ;;  %s805_s1 = inlined_call_operand.hbm [shape: f32[32,32], index: 1, kind: input, shape index: {}]   ;;  %s806_s2 = inlined_call_operand.vmem [shape: f32[1,32], index: 2, kind: input, shape index: {}]   ;;  %s807_s3 = inlined_call_operand.hbm [shape: f32[16,32], index: 3, kind: output, shape index: {}]  }
   0x1   :  { %10 = vsyncpa [#allocation3 + $0x1], 0 }
   0x2   :  { %11 = vsyncpa [#allocation6], 0 }
   0x3   :  { %12 = vsyncpa [#allocation4], 0 }
   0x4   :  { %14 = vsyncpa [#allocation4 + $0x1], 0  ;;  %s658_s12 = smov 0   ;;  %s660_s13 = smov 0  }
   0x5   :  { %s662_s14 = smov 0   ;;  %s664_s15 = smov 0  }
   0x6   :  { %s666_s16 = smov 0   ;;  %s668_s17 = smov 0  }
   0x7 LB: > { %s394_s18 = sadd.s32 4294967295, %s633_s17   ;;  %p396_p0 = scmp.ge.s32.totalorder %s633_s17, 1  ;;  %s633_s17 = sphi %s668_s17, %s20_s17   ;;  %s629_s16 = sphi %s666_s16, %s818_s16   ;;  %s625_s15 = sphi %s664_s15, %s817_s15   ;;  %s621_s14 = sphi %s662_s14, %s816_s14   ;;  %s617_s13 = sphi %s660_s13, %s815_s13   ;;  %s613_s12 = sphi %s658_s12, %s814_s12  }
   0x8   : > { %p690_p1 = scmp.eq.s32.totalorder %s394_s18, 0  ;;  %p143_p2 = scmp.lt.s32.totalorder %s633_s17, 3 }
   0x9   : > { %s156_s22 = sshll.u32 %s805_s1, 4  ;;  %s635_s24 = smov [#allocation5]   ;;  %s157_s22 = int_to_ptr.hbm [resolvable:$true] %s156_s22 }
   0xa   : > { %p698_p3 = pnand %p396_p0, %p143_p2  ;;  %s158_s25 = sshll.u32 %s635_s24, 4  ;;  %s159_s25 = int_to_ptr.vmem [resolvable:$true] %s158_s25 }
   0xb   : > { %p399_p6 = scmp.ge.s32.totalorder %s633_s17, 2  ;;  %s636_s26 = smov 128  }
   0xc   : > { %p419_p4 = pneg %p698_p3  ;;  %s637_s27 = smov 8  }
   0xd   : > { %s395_s28 = sadd.s32 4294967294, %s633_s17   ;;  %s32_s29 = sadd.s32 1, %s629_s16 }
   0xe   : > { %p420_p5 = pnand %p419_p4, %p690_p1  ;;  %s39_s30 = sadd.s32 1, %s621_s14 }
   0xf   : > { %p34_p7 = scmp.ge.s32.totalorder %s32_s29, 2  ;;  %p46_p8 = scmp.ne.s32.totalorder %s621_s14, %s617_s13 }
  0x10   : > { %422 = dma.hbm_to_vmem [thread:$0]  (!%p420_p5), %s157_s22, 512, %s159_s25, [#allocation6], %s636_s26, %s636_s26, %s637_s27  }
  0x11   : > { %p47_p9 = scmp.eq.s32.totalorder %s633_s17, 0  ;;  %p52_p10 = scmp.ne.s32.totalorder %s617_s13, %s613_s12 }
  0x12   : > { %s820_s29 = smov (%p34_p7, %s32_s29), 0  ;;  %p130_p13 = scmp.eq.s32.totalorder %s394_s18, 1 }
  0x13   : > { %p717_p11 = por %p47_p9, %p46_p8  ;;  %p723_p12 = por %p690_p1, %p52_p10 }
  0x14   : > { %s36_s6 = ssub.s32 %s629_s16, %s820_s29  ;;  %p136_p2 = scmp.eq.s32.totalorder %s395_s28, 1 }
  0x15   : > { %p37_p0 = scmp.eq.s32.totalorder %s36_s6, 0  ;;  %p729_p4 = por %p130_p13, %p46_p8 }
  0x16   : > { %p432_p5 = scmp.lt.s32.totalorder %s633_s17, 2  ;;  %p737_p7 = por %p136_p2, %p52_p10 }
  0x17   : > { %s735_s8 = scalar_select %p37_p0, %s621_s14, %s39_s30  }
  0x18   : > { %s178_s10 = sand.u32 1, %s621_s14   ;;  %s401_s20 = sshll.u32 %s629_s16, 3 }
  0x19   : > { %s400_s11 = sshll.u32 %s178_s10, 3  ;;  %s186_s18 = scalar_lea.hbm %s804_s0, %s401_s20 }
  0x1a   : > { %s182_s24 = scalar_lea.vmem [#allocation2], %s400_s11  ;;  %s188_s26 = sshll.u32 %s186_s18, 4  ;;  %s189_s26 = int_to_ptr.hbm [resolvable:$true] %s188_s26 }
  0x1b   : > { %s190_s25 = sshll.u32 %s182_s24, 4  ;;  %p424_p8 = pnand %p432_p5, %p717_p11  ;;  %s191_s25 = int_to_ptr.vmem [resolvable:$true] %s190_s25 }
  0x1c   : > { %s179_s27 = scalar_lea.sflag [#allocation3], %s178_s10  ;;  %199 = sbr.rel (%p698_p3) target bundleno = 175 (0xaf), region = 32 }
  0x1d   : > { %426 = dma.hbm_to_vmem [thread:$0]  (!%p424_p8), %s189_s26, 128, %s191_s25, %s179_s27  }
  0x1e   : > { %s751_s28 = sand.u32 (!%p698_p3), 1, %s617_s13  }
  0x1f   : > { %s403_s30 = sshll.u32 (!%p698_p3), %s751_s28, 3  ;;  %s202_s6 = scalar_lea.sflag (!%p698_p3), [#allocation3], %s751_s28 }
  0x20   : > { %s205_s11 = scalar_lea.vmem (!%p698_p3), [#allocation2], %s403_s30 }
  0x21   : > { %600 = dma.done.wait (%p723_p12), %s202_s6, 128  }
  0x22   : > { %602 = vsyncadd (%p723_p12), %s202_s6, 4294967168 }
  0x23   : > { %604 = dma.done.wait (%p690_p1), [#allocation6], 512  }
  0x24   : > { %606 = vsyncadd (%p690_p1), [#allocation6], 4294966784  ;;  %v244_v0 = vld [vmem:[#allocation5 + $0x18] sm:$0xff]  ;;  %v243_v1 = vld [vmem:[#allocation5 + $0x10] sm:$0xff]  ;;  %vm249_vm0 = vcmask 261120   ;;  %s408_s23 = sshll.u32 %s625_s15, 3 }
  0x25   : > { %265 = vmatpush.msra.mxu0 %v244_v0  ;;  %v242_v2 = vld [vmem:[#allocation5 + $0x8] sm:$0xff]  ;;  %v241_v3 = vld [vmem:[#allocation5] sm:$0xff]  ;;  %v240_v4 = vld [vmem:[%s205_s11] sm:$0xff]  ;;  %s286_s19 = scalar_lea.hbm %s807_s3, %s408_s23  ;;  %s236_s21 = scalar_lea.vmem [#allocation7], %s403_s30 }
  0x26   : > { %v486_v5 = vld [vmem:[%s806_s2] ss:$0 sm:$0xff]  ;;  %s288_s22 = sshll.u32 %s236_s21, 4  ;;  %s290_s18 = sshll.u32 %s286_s19, 4  ;;  %s289_s22 = int_to_ptr.vmem [resolvable:$true] %s288_s22  ;;  %s291_s18 = int_to_ptr.hbm [resolvable:$true] %s290_s18 }
  0x27   : > { %266 = vmatpush.msra.mxu0 %v243_v1  ;;  %s275_s24 = scalar_lea.sflag [#allocation4], %s751_s28  ;;  %s561_s25 = sshra.s32 %s291_s18, 4  ;;  %s562_s25 = int_to_ptr.hbm [resolvable:$true] %s561_s25 }
  0x28   : > { %s563_s15 = scalar_lea.hbm %s562_s25, 8  ;;  %s567_s6 = scalar_lea.hbm %s807_s3, 16 }
  0x29   : > { %267 = vmatpush.msra.mxu0 %v242_v2  ;;  %p564_p1 = scmp.ne.s32.totalorder %s562_s25, %s563_s15  ;;  %p568_p10 = scmp.lt.s32.totalorder %s562_s25, %s807_s3 }
  0x2a   : > { %p569_p11 = scmp.lt.s32.totalorder %s567_s6, %s563_s15 }
  0x2b   : > { %268 = vmatpush.msra.mxu0 %v241_v3  ;;  %p565_p3 = pnand %p564_p1, %p729_p4 }
  0x2c   : > { %406 = vmatmul.msk.f32.vlgmr.msra.gmra.mxu0 %vm249_vm0, %v240_v4  ;;  %p570_p12 = por %p569_p11, %p568_p10 }
  0x2d   : > { %p566_p9 = pneg %p565_p3 }
  0x2f   : > { %p571_p13 = pnand %p570_p12, %p566_p9 }
  0xa9   : > { %v270_v6 = vpop.f32.mrf.mxu0 }
  0xaa   : > { %v271_v7 = vadd.f32 %v486_v5, %v270_v6 }
  0xac   : > { %273 = vst.msk [vmem:[%s236_s21] sm:$0xff] %vm249_vm0, %v271_v7 }
  0xad   : > { %574 = shalt.err (!%p571_p13)
}
  0xae   : > { %417 = dma.vmem_to_hbm [thread:$0]  (%p729_p4), %s289_s22, 128, %s291_s18, %s275_s24  }
  0xaf PF: > { %s302_s28 = sand.u32 1, %s613_s12   ;;  %p428_p0 = pnand %p399_p6, %p737_p7 }
  0xb0   : > { %s303_s23 = scalar_lea.sflag [#allocation4], %s302_s28 }
  0xb1   : > { %p429_p2 = pneg %p428_p0 }
  0xb3   : > { %608 = dma.done.wait (%p429_p2), %s303_s23, 128  }
  0xb4   : > { %610 = vsyncadd (%p429_p2), %s303_s23, 4294967168  ;;  %s20_s17 = sadd.s32 1, %s633_s17   ;;  %s814_s12 = smov %s617_s13 }
  0xb5   : > { %p17_p5 = scmp.ge.s32.totalorder %s20_s17, 4   ;;  %s815_s13 = smov %s621_s14 }
  0xb6   : > { %s816_s14 = smov %s735_s8  ;;  %s817_s15 = smov %s629_s16 }
  0xb7   : > { %s818_s16 = smov %s820_s29  ;;  %19 = sbr.rel (!%p17_p5) target bundleno = 7 (0x7), region = 85 }
  0xbc   :  { %309 = vsyncpa [#allocation3], 1 }
  0xbd   :  { %311 = vsyncpa [#allocation3 + $0x1], 1 }
  0xbe   :  { %312 = vsyncpa [#allocation6], 1 }
  0xbf   :  { %313 = vsyncpa [#allocation4], 1 }
  0xc0   :  { %315 = vsyncpa [#allocation4 + $0x1], 1 }

</bundles_post_ra>
